<compile_context>
chip_gen: v7x
topology: tpu7x:2x2x1
jax: 0.10.0
libtpu: 0.0.40
codegen_flags: <defaults>
</compile_context>

<pallas_src>
import functools

import jax
import jax.numpy as jnp
from jax.experimental import pallas as pl
from jax.experimental.pallas import tpu as pltpu


def _round_up(x: int, m: int) -> int:
    return (x + m - 1) // m * m


def _mlp_fused_kernel(n_layers, mxu_dtype, *refs):
    """refs = (x_ref, w0_ref, b0_ref, w1_ref, b1_ref, ..., o_ref).

    Entire layer chain runs on one row-tile; intermediate activations stay in
    VMEM/vregs (never written to HBM).
    """
    x_ref = refs[0]
    o_ref = refs[1 + 2 * n_layers]

    h = x_ref[...].astype(jnp.float32)
    for i in range(n_layers):
        w_ref = refs[1 + 2 * i]       # (K_pad, N_pad), already mxu_dtype
        b_ref = refs[2 + 2 * i]       # (1, N_pad), f32
        y = jnp.dot(h.astype(mxu_dtype), w_ref[...].astype(mxu_dtype),
                    preferred_element_type=jnp.float32)
        y = y + b_ref[...]            # f32 bias add on VPU
        if i < n_layers - 1:
            y = jnp.tanh(y)           # f32 tanh on EUP
        h = y
    o_ref[...] = h.astype(o_ref.dtype)


def mlp_pallas(x, params, *, tm_target: int = 256, mxu_dtype=jnp.bfloat16):
    """Fused MLP forward: y = Lin_n(... Tanh(Lin_0(x)) ...).

    x: (batch, in_features) f32
    params: list of (w, b) with w: (in, out), b: (1, out)   (w == torch_w.T)
    """
    M, K0 = x.shape
    n_layers = len(params)
    sizes = [K0] + [w.shape[1] for (w, _) in params]

    # Lane-dense padded feature sizes (multiples of 128). Zero padding is
    # exact: padded hidden cols get 0 (tanh(0)=0) and padded weight rows are 0.
    psizes = [_round_up(s, 128) for s in sizes]

    # Row tile: feed the MXU well, but don't over-pad a genuinely tiny batch.
    tm = min(tm_target, _round_up(M, 8))
    M_pad = _round_up(M, tm)

    # ---- pad inputs / params (wrapper-side, cheap relative to the kernel) ---
    x_p = jnp.zeros((M_pad, psizes[0]), x.dtype).at[:M, :K0].set(x)

    flat_inputs = [x_p]
    in_specs = [pl.BlockSpec((tm, psizes[0]), lambda i: (i, 0))]
    for li, (w, b) in enumerate(params):
        kin, kout = w.shape
        w_p = (jnp.zeros((psizes[li], psizes[li + 1]), mxu_dtype)
               .at[:kin, :kout].set(w.astype(mxu_dtype)))
        b_p = (jnp.zeros((1, psizes[li + 1]), jnp.float32)
               .at[:, :kout].set(b.astype(jnp.float32)))
        flat_inputs += [w_p, b_p]
        # Constant block index -> weight/bias stay resident in VMEM across M.
        in_specs.append(pl.BlockSpec(w_p.shape, lambda i: (0, 0)))
        in_specs.append(pl.BlockSpec(b_p.shape, lambda i: (0, 0)))

    # TODO(synk): for production-scale hidden sizes, add a K-reduction grid
    # axis + f32 accumulator and tile N so each weight block fits v7x's 64 MiB
    # VMEM; at these (padded 128-wide) sizes the full weights fit trivially.

    flops = sum(2 * M_pad * psizes[i] * psizes[i + 1] for i in range(n_layers))
    transcendentals = sum(M_pad * psizes[i + 1] for i in range(n_layers - 1))
    bytes_accessed = (
        x_p.size * x_p.dtype.itemsize
        + sum(a.size * a.dtype.itemsize for a in flat_inputs[1:])
        + M_pad * psizes[-1] * x.dtype.itemsize)

    out_p = pl.pallas_call(
        functools.partial(_mlp_fused_kernel, n_layers, mxu_dtype),
        out_shape=jax.ShapeDtypeStruct((M_pad, psizes[-1]), x.dtype),
        grid_spec=pltpu.PrefetchScalarGridSpec(
            num_scalar_prefetch=0,
            grid=(M_pad // tm,),
            in_specs=in_specs,
            out_specs=pl.BlockSpec((tm, psizes[-1]), lambda i: (i, 0)),
        ),
        compiler_params=pltpu.CompilerParams(
            dimension_semantics=("parallel",)),
        cost_estimate=pl.CostEstimate(
            flops=flops,
            transcendentals=transcendentals,
            bytes_accessed=bytes_accessed),
    )(*flat_inputs)

    # Strip batch / feature padding.
    return out_p[:M, :sizes[-1]]


def init_mlp_params(key, sizes):
    """Deterministic synthetic parameters (same init scheme as nn.Linear)."""
    params = []
    for i in range(len(sizes) - 1):
        key, kw, kb = jax.random.split(key, 3)
        fan_in, fan_out = sizes[i], sizes[i + 1]
        bound = 1.0 / jnp.sqrt(fan_in)
        # Stored as (in, out) == torch weight (out, in) transposed.
        w = jax.random.uniform(kw, (fan_in, fan_out), jnp.float32, -bound, bound)
        b = jax.random.uniform(kb, (1, fan_out), jnp.float32, -bound, bound)
        params.append((w, b))
    return params


def mlp_reference(x, params):
    """Pure-JAX f32 reference (matches torch.nn.Sequential semantics)."""
    n_layers = len(params)
    h = x
    for i, (w, b) in enumerate(params):
        h = h @ w + b
        if i < n_layers - 1:
            h = jnp.tanh(h)
    return h


if __name__ == "__main__":
    # Small shapes consistent with the ClipCap MLP usage:
    #   sizes = (prefix_dim, hidden, out_dim), input x: (batch, prefix_dim)
    # batch=10 deliberately not a multiple of 8 to exercise the padding path.
    sizes = (32, 64, 48)
    batch = 10

    key = jax.random.PRNGKey(0)
    key, kx = jax.random.split(key)
    x = jax.random.normal(kx, (batch, sizes[0]), jnp.float32)
    params = init_mlp_params(key, sizes)

    out = mlp_forward = mlp_pallas(x, params)
    out = jax.block_until_ready(out)

    ref = mlp_reference(x, params)
    assert out.shape == (batch, sizes[-1])
    # bf16 MXU inputs with f32 accumulation -> compare against f32 reference
    # with a bf16-appropriate tolerance.
    assert jnp.allclose(out, ref, atol=5e-2, rtol=5e-2), (
        float(jnp.max(jnp.abs(out - ref))))

    print("KERNEL_OK")
</pallas_src>

<mosaic_0001>
module attributes {stable_mosaic.version = 11 : i64} {
  func.func @_mlp_fused_kernel(%arg0: i32, %arg1: memref<16x128xf32, #tpu.memory_space<vmem>>, %arg2: memref<128x128xbf16, #tpu.memory_space<vmem>>, %arg3: memref<1x128xf32, #tpu.memory_space<vmem>>, %arg4: memref<128x128xbf16, #tpu.memory_space<vmem>>, %arg5: memref<1x128xf32, #tpu.memory_space<vmem>>, %arg6: memref<16x128xf32, #tpu.memory_space<vmem>>) attributes {dimension_semantics = [#tpu.dimension_semantics<parallel>], iteration_bounds = array<i64: 1>, scalar_prefetch = 0 : i64, scratch_operands = 0 : i64, tpu.core_type = #tpu.core_type<tc>, window_params = [{transform_indices = @transform_0, window_bounds = array<i64: 16, 128>}, {pipeline_mode = #tpu.pipeline_mode<synchronous>, transform_indices = @transform_1, window_bounds = array<i64: 128, 128>}, {pipeline_mode = #tpu.pipeline_mode<synchronous>, transform_indices = @transform_2, window_bounds = array<i64: 1, 128>}, {pipeline_mode = #tpu.pipeline_mode<synchronous>, transform_indices = @transform_3, window_bounds = array<i64: 128, 128>}, {pipeline_mode = #tpu.pipeline_mode<synchronous>, transform_indices = @transform_4, window_bounds = array<i64: 1, 128>}, {transform_indices = @transform_5, window_bounds = array<i64: 16, 128>}]} {
    %c0 = arith.constant 0 : index
    %c0_0 = arith.constant 0 : index
    %0 = vector.load %arg1[%c0, %c0_0] : memref<16x128xf32, #tpu.memory_space<vmem>>, vector<16x128xf32>
    %1 = arith.truncf %0 : vector<16x128xf32> to vector<16x128xbf16>
    %c0_1 = arith.constant 0 : index
    %c0_2 = arith.constant 0 : index
    %2 = vector.load %arg2[%c0_1, %c0_2] : memref<128x128xbf16, #tpu.memory_space<vmem>>, vector<128x128xbf16>
    %cst = arith.constant dense<0.000000e+00> : vector<16x128xf32>
    %3 = tpu.matmul %1, %2, %cst {dimension_numbers = #tpu.dot_dimension_numbers<[1], [0], [0], [1], [0, 0, 1, 1], [], []>} : vector<16x128xbf16>, vector<128x128xbf16>, vector<16x128xf32> -> vector<16x128xf32>
    %c0_3 = arith.constant 0 : index
    %c0_4 = arith.constant 0 : index
    %4 = vector.load %arg3[%c0_3, %c0_4] : memref<1x128xf32, #tpu.memory_space<vmem>>, vector<1x128xf32>
    %5 = vector.broadcast %4 : vector<1x128xf32> to vector<16x128xf32>
    %6 = arith.addf %3, %5 : vector<16x128xf32>
    %7 = math.tanh %6 : vector<16x128xf32>
    %8 = arith.truncf %7 : vector<16x128xf32> to vector<16x128xbf16>
    %c0_5 = arith.constant 0 : index
    %c0_6 = arith.constant 0 : index
    %9 = vector.load %arg4[%c0_5, %c0_6] : memref<128x128xbf16, #tpu.memory_space<vmem>>, vector<128x128xbf16>
    %cst_7 = arith.constant dense<0.000000e+00> : vector<16x128xf32>
    %10 = tpu.matmul %8, %9, %cst_7 {dimension_numbers = #tpu.dot_dimension_numbers<[1], [0], [0], [1], [0, 0, 1, 1], [], []>} : vector<16x128xbf16>, vector<128x128xbf16>, vector<16x128xf32> -> vector<16x128xf32>
    %c0_8 = arith.constant 0 : index
    %c0_9 = arith.constant 0 : index
    %11 = vector.load %arg5[%c0_8, %c0_9] : memref<1x128xf32, #tpu.memory_space<vmem>>, vector<1x128xf32>
    %12 = vector.broadcast %11 : vector<1x128xf32> to vector<16x128xf32>
    %13 = arith.addf %10, %12 : vector<16x128xf32>
    %c0_10 = arith.constant 0 : index
    %c0_11 = arith.constant 0 : index
    %14 = vector.load %arg6[%c0_10, %c0_11] : memref<16x128xf32, #tpu.memory_space<vmem>>, vector<16x128xf32>
    tpu.vector_store %arg6[%c0_10, %c0_11], %13 {strides = array<i32>} : memref<16x128xf32, #tpu.memory_space<vmem>>, vector<16x128xf32>,
    return
  }
  func.func @transform_0(%arg0: i32) -> (i32, i32) {
    %c0_i32 = arith.constant 0 : i32
    %c0_i32_0 = arith.constant 0 : i32
    return %arg0, %c0_i32 : i32, i32
  }
  func.func @transform_1(%arg0: i32) -> (i32, i32) {
    %c0_i32 = arith.constant 0 : i32
    %c0_i32_0 = arith.constant 0 : i32
    %c0_i32_1 = arith.constant 0 : i32
    return %c0_i32, %c0_i32_0 : i32, i32
  }
  func.func @transform_2(%arg0: i32) -> (i32, i32) {
    %c0_i32 = arith.constant 0 : i32
    %c0_i32_0 = arith.constant 0 : i32
    %c0_i32_1 = arith.constant 0 : i32
    return %c0_i32, %c0_i32_0 : i32, i32
  }
  func.func @transform_3(%arg0: i32) -> (i32, i32) {
    %c0_i32 = arith.constant 0 : i32
    %c0_i32_0 = arith.constant 0 : i32
    %c0_i32_1 = arith.constant 0 : i32
    return %c0_i32, %c0_i32_0 : i32, i32
  }
  func.func @transform_4(%arg0: i32) -> (i32, i32) {
    %c0_i32 = arith.constant 0 : i32
    %c0_i32_0 = arith.constant 0 : i32
    %c0_i32_1 = arith.constant 0 : i32
    return %c0_i32, %c0_i32_0 : i32, i32
  }
  func.func @transform_5(%arg0: i32) -> (i32, i32) {
    %c0_i32 = arith.constant 0 : i32
    %c0_i32_0 = arith.constant 0 : i32
    return %arg0, %c0_i32 : i32, i32
  }
}

</mosaic_0001>

<bundles_post_ra>
// kernel: tpu_custom_call.1
= control target key start
LH: loop header
LB: loop body
LE: loop exit
PB: predicated region body
PF: predicated region fallthrough
CT: control target
= control target key end

     0   :  { %10 = vsyncpa [#allocation3], 0  ;;  %s619_s0 = inlined_call_operand.hbm [shape: f32[16,128], index: 0, kind: input, shape index: {}]   ;;  %s620_s1 = inlined_call_operand.hbm [shape: bf16[128,128], index: 1, kind: input, shape index: {}]   ;;  %s621_s2 = inlined_call_operand.vmem [shape: f32[1,128], index: 2, kind: input, shape index: {}]   ;;  %s622_s3 = inlined_call_operand.hbm [shape: bf16[128,128], index: 3, kind: input, shape index: {}]   ;;  %s623_s4 = inlined_call_operand.vmem [shape: f32[1,128], index: 4, kind: input, shape index: {}]   ;;  %s624_s5 = inlined_call_operand.hbm [shape: f32[16,128], index: 5, kind: output, shape index: {}]  }
   0x1   :  { %11 = vsyncpa [#allocation6], 0 }
   0x2   :  { %12 = vsyncpa [#allocation4], 0  ;;  %s513_s18 = smov [#allocation5]   ;;  %s419_s22 = scalar_lea.hbm %s620_s1, 1024 }
   0x3   :  { %s30_s19 = sshll.u32 %s513_s18, 4  ;;  %p420_p0 = scmp.ne.s32.totalorder %s620_s1, %s419_s22  ;;  %s31_s19 = int_to_ptr.vmem [resolvable:$true] %s30_s19 }
   0x4   :  { %p423_p1 = scmp.lt.u32.totalorder %s419_s22, %s620_s1 }
   0x6   :  { %p425_p2 = pnand %p423_p1, %p420_p0 }
   0x8   :  { %428 = shalt.err (!%p425_p2)
}
   0x9   :  { %s429_s27 = scalar_lea.vmem %s31_s19, 1024  ;;  %p434_p4 = scmp.lt.s32.totalorder %s31_s19, %s31_s19 }
   0xa   :  { %p430_p3 = scmp.ne.s32.totalorder %s31_s19, %s429_s27  ;;  %p435_p5 = scmp.lt.s32.totalorder %s429_s27, %s429_s27 }
   0xc   :  { %p436_p6 = por %p435_p5, %p434_p4 }
   0xe   :  { %p437_p7 = pnand %p436_p6, %p430_p3 }
  0x10   :  { %440 = shalt.err (!%p437_p7)
}
  0x11   :  { %s514_s28 = smov 64   ;;  %s515_s29 = smov 4  }
  0x12   :  { %36 = dma.hbm_to_vmem [thread:$0]  %s620_s1, 1024, %s31_s19, [#allocation6], %s514_s28, %s514_s28, %s515_s29  }
  0x13   :  { %s516_s7 = smov [#allocation2]   ;;  %s441_s11 = scalar_lea.hbm %s619_s0, 256 }
  0x14   :  { %s18_s8 = sshll.u32 %s516_s7, 4  ;;  %p442_p8 = scmp.ne.s32.totalorder %s619_s0, %s441_s11  ;;  %s19_s8 = int_to_ptr.vmem [resolvable:$true] %s18_s8 }
  0x15   :  { %p445_p9 = scmp.lt.u32.totalorder %s441_s11, %s619_s0 }
  0x17   :  { %p447_p10 = pnand %p445_p9, %p442_p8 }
  0x19   :  { %450 = shalt.err (!%p447_p10)
}
  0x1a   :  { %s451_s16 = scalar_lea.vmem %s19_s8, 256  ;;  %p456_p12 = scmp.lt.s32.totalorder %s19_s8, %s19_s8 }
  0x1b   :  { %p452_p11 = scmp.ne.s32.totalorder %s19_s8, %s451_s16  ;;  %p457_p13 = scmp.lt.s32.totalorder %s451_s16, %s451_s16 }
  0x1d   :  { %p458_p0 = por %p457_p13, %p456_p12 }
  0x1f   :  { %p459_p1 = pnand %p458_p0, %p452_p11 }
  0x21   :  { %462 = shalt.err (!%p459_p1)
}
  0x22   :  { %s517_s1 = smov 128   ;;  %s518_s17 = smov 8  }
  0x23   :  { %24 = dma.hbm_to_vmem [thread:$0]  %s619_s0, 256, %s19_s8, [#allocation3], %s517_s1, %s517_s1, %s518_s17  }
  0x24   :  { %s519_s20 = smov [#allocation7]   ;;  %s463_s24 = scalar_lea.hbm %s622_s3, 1024 }
  0x25   :  { %s44_s21 = sshll.u32 %s519_s20, 4  ;;  %p464_p2 = scmp.ne.s32.totalorder %s622_s3, %s463_s24  ;;  %s45_s21 = int_to_ptr.vmem [resolvable:$true] %s44_s21 }
  0x26   :  { %p467_p3 = scmp.lt.u32.totalorder %s463_s24, %s622_s3 }
  0x28   :  { %p469_p4 = pnand %p467_p3, %p464_p2 }
  0x2a   :  { %472 = shalt.err (!%p469_p4)
}
  0x2b   :  { %s473_s6 = scalar_lea.vmem %s45_s21, 1024  ;;  %p478_p6 = scmp.lt.s32.totalorder %s45_s21, %s45_s21 }
  0x2c   :  { %p474_p5 = scmp.ne.s32.totalorder %s45_s21, %s473_s6  ;;  %p479_p7 = scmp.lt.s32.totalorder %s473_s6, %s473_s6 }
  0x2e   :  { %p480_p8 = por %p479_p7, %p478_p6 }
  0x30   :  { %p481_p9 = pnand %p480_p8, %p474_p5 }
  0x32   :  { %484 = shalt.err (!%p481_p9)
}
  0x33   :  { %50 = dma.hbm_to_vmem [thread:$0]  %s622_s3, 1024, %s45_s21, [#allocation6], %s514_s28, %s514_s28, %s515_s29  }
  0x34   :  { %507 = dma.done.wait [#allocation3], 256  }
  0x35   :  { %508 = vsyncadd [#allocation3], 4294967040 }
  0x36   :  { %509 = dma.done.wait [#allocation6], 2048  }
  0x37   :  { %510 = vsyncadd [#allocation6], 4294965248  ;;  %v520_v0 = vmov 0.0   ;;  %vm521_vm0 = vmmov 0   ;;  %v399_v1 = vld [vmem:[#allocation5] sm:$0xff]   ;;  %v400_v2 = vld [vmem:[#allocation5 + $0x8] sm:$0xff]  }
  0x38   :  { %349 = vmatprep.subr.bf16.mxu0 %v520_v0  ;;  %365 = vmatprep.mubr.msk.bf16.mxu0 %vm521_vm0, %v520_v0  ;;  %v401_v3 = vld [vmem:[#allocation5 + $0x10] sm:$0xff]   ;;  %v407_v4 = vld [vmem:[#allocation7] sm:$0xff]   ;;  %v402_v5 = vld [vmem:[#allocation5 + $0x18] sm:$0xff]   ;;  %s522_s9 = smov [#allocation8]  }
  0x39   :  { %369 = vmatprep.subr.bf16.mxu1 %v520_v0  ;;  %385 = vmatprep.mubr.msk.bf16.mxu1 %vm521_vm0, %v520_v0  ;;  %v408_v6 = vld [vmem:[#allocation7 + $0x8] sm:$0xff]   ;;  %v403_v7 = vld [vmem:[#allocation5 + $0x20] sm:$0xff]   ;;  %v409_v8 = vld [vmem:[#allocation7 + $0x10] sm:$0xff]   ;;  %s300_s10 = sshll.u32 %s522_s9, 4  ;;  %s301_s10 = int_to_ptr.vmem [resolvable:$true] %s300_s10 }
  0x3a   :  { %350 = vmatpush3.bf16.msra.mxu0 %v399_v1  ;;  %370 = vmatpush3.bf16.msra.mxu1 %v407_v4  ;;  %v404_v9 = vld [vmem:[#allocation5 + $0x28] sm:$0xff]   ;;  %v410_v10 = vld [vmem:[#allocation7 + $0x18] sm:$0xff]   ;;  %v405_v11 = vld [vmem:[#allocation5 + $0x30] sm:$0xff]   ;;  %p490_p11 = scmp.lt.s32.totalorder %s301_s10, %s301_s10 }
  0x3b   :  { %351 = vmatprep.subr.bf16.mxu0 %v520_v0  ;;  %371 = vmatprep.subr.bf16.mxu1 %v520_v0  ;;  %v406_v12 = vld [vmem:[#allocation5 + $0x38] sm:$0xff]   ;;  %v63_v13 = vld [vmem:[#allocation2] sm:$0xff]  ;;  %v411_v16 = vld [vmem:[#allocation7 + $0x20] sm:$0xff]  }
  0x3c   :  { %v64_v14 = vld [vmem:[#allocation2 + $0x8] sm:$0xff]  ;;  %v412_v17 = vld [vmem:[#allocation7 + $0x28] sm:$0xff]   ;;  %v413_v18 = vld [vmem:[#allocation7 + $0x30] sm:$0xff]  }
  0x3d   :  { %v65_v15 = vpack.c.bf16 %v64_v14, %v63_v13  ;;  %v414_v19 = vld [vmem:[#allocation7 + $0x38] sm:$0xff]   ;;  %v313_v20 = vld [vmem:[%s621_s2] ss:$0 sm:$0xff]  ;;  %s485_s2 = scalar_lea.vmem %s301_s10, 256 }
  0x3e   :  { %352 = vmatpush3.bf16.msra.mxu0 %v400_v2  ;;  %372 = vmatpush3.bf16.msra.mxu1 %v408_v6  ;;  %v322_v30 = vld [vmem:[%s623_s4] ss:$0 sm:$0xff]  ;;  %p486_p10 = scmp.ne.s32.totalorder %s301_s10, %s485_s2  ;;  %p491_p12 = scmp.lt.s32.totalorder %s485_s2, %s485_s2 }
  0x3f   :  { %353 = vmatprep.subr.bf16.mxu0 %v520_v0  ;;  %373 = vmatprep.subr.bf16.mxu1 %v520_v0 }
  0x40   :  { %p492_p13 = por %p491_p12, %p490_p11 }
  0x42   :  { %354 = vmatpush3.bf16.msra.mxu0 %v401_v3  ;;  %374 = vmatpush3.bf16.msra.mxu1 %v409_v8  ;;  %p493_p0 = pnand %p492_p13, %p486_p10 }
  0x43   :  { %355 = vmatprep.subr.bf16.mxu0 %v520_v0  ;;  %375 = vmatprep.subr.bf16.mxu1 %v520_v0 }
  0x46   :  { %356 = vmatpush3.bf16.msra.mxu0 %v402_v5  ;;  %376 = vmatpush3.bf16.msra.mxu1 %v410_v10 }
  0x47   :  { %357 = vmatprep.subr.bf16.mxu0 %v520_v0  ;;  %377 = vmatprep.subr.bf16.mxu1 %v520_v0 }
  0x4a   :  { %358 = vmatpush3.bf16.msra.mxu0 %v403_v7  ;;  %378 = vmatpush3.bf16.msra.mxu1 %v411_v16 }
  0x4b   :  { %359 = vmatprep.subr.bf16.mxu0 %v520_v0  ;;  %379 = vmatprep.subr.bf16.mxu1 %v520_v0 }
  0x4e   :  { %360 = vmatpush3.bf16.msra.mxu0 %v404_v9  ;;  %380 = vmatpush3.bf16.msra.mxu1 %v412_v17 }
  0x4f   :  { %361 = vmatprep.subr.bf16.mxu0 %v520_v0  ;;  %381 = vmatprep.subr.bf16.mxu1 %v520_v0 }
  0x52   :  { %362 = vmatpush3.bf16.msra.mxu0 %v405_v11  ;;  %382 = vmatpush3.bf16.msra.mxu1 %v413_v18 }
  0x53   :  { %363 = vmatprep.subr.bf16.mxu0 %v520_v0  ;;  %383 = vmatprep.subr.bf16.mxu1 %v520_v0 }
  0x56   :  { %364 = vmatpush3.bf16.msra.mxu0 %v406_v12  ;;  %384 = vmatpush3.bf16.msra.mxu1 %v414_v19 }
  0x59   :  { %366 = vmatmul.mubr.bf16.vlgmr.msra.gmra.mrb[0].mxu0 %v65_v15 }
 0x12c   :  { %v171_v21 = vpop.f32.mrb[0].mxu0 }
 0x12d   :  { %v172_v22 = vadd.f32 %v313_v20, %v171_v21  ;;  %v367_v23 = vpop.f32.mrb[1].mxu0 }
 0x12e   :  { %v174_v24 = vpop.f32.mrb[2].mxu0 }
 0x12f   :  { %v175_v25 = vadd.f32 %v313_v20, %v174_v24  ;;  %v368_v26 = vpop.f32.mrb[3].mxu0  ;;  %415 = vtanh.f32 %v172_v22 }
 0x131   :  { %417 = vtanh.f32 %v175_v25 }
 0x139   :  { %v416_v27 = vpop.eup %415 }
 0x13b   :  { %v418_v28 = vpop.eup %417 }
 0x13c   :  { %v180_v29 = vpack.c.bf16 %v418_v28, %v416_v27 }
 0x13e   :  { %386 = vmatmul.mubr.bf16.vlgmr.msra.gmra.mrb[0].mxu1 %v180_v29 }
 0x211   :  { %v286_v31 = vpop.f32.mrb[0].mxu1 }
 0x212   :  { %v287_v32 = vadd.f32 %v322_v30, %v286_v31  ;;  %v387_v33 = vpop.f32.mrb[1].mxu1 }
 0x213   :  { %v289_v34 = vpop.f32.mrb[2].mxu1 }
 0x214   :  { %293 = vst [vmem:[#allocation8] sm:$0xff] %v287_v32  ;;  %v290_v35 = vadd.f32 %v322_v30, %v289_v34  ;;  %v388_v36 = vpop.f32.mrb[3].mxu1 }
 0x216   :  { %294 = vst [vmem:[#allocation8 + $0x8] sm:$0xff] %v290_v35 }
 0x217   :  { %496 = shalt.err (!%p493_p0)
}
 0x218   :  { %s497_s12 = scalar_lea.hbm %s624_s5, 256 }
 0x219   :  { %p498_p1 = scmp.ne.s32.totalorder %s624_s5, %s497_s12  ;;  %p501_p2 = scmp.lt.u32.totalorder %s497_s12, %s624_s5 }
 0x21b   :  { %p503_p3 = pnand %p501_p2, %p498_p1 }
 0x21d   :  { %506 = shalt.err (!%p503_p3)
}
 0x21e   :  { %306 = dma.vmem_to_hbm [thread:$0]  %s301_s10, 256, %s624_s5, [#allocation4], %s517_s1, %s517_s1, %s518_s17  }
 0x21f   :  { %511 = dma.done.wait [#allocation4], 256  }
 0x220   :  { %512 = vsyncadd [#allocation4], 4294967040 }
 0x221   :  { %310 = vsyncpa [#allocation3], 1 }
 0x222   :  { %311 = vsyncpa [#allocation6], 1 }
 0x223   :  { %312 = vsyncpa [#allocation4], 1 }

</bundles_post_ra>
